<compile_context>
chip_gen: v7x
topology: tpu7x:2x2x1
jax: 0.10.0
libtpu: 0.0.40
codegen_flags: <defaults>
</compile_context>

<pallas_src>
import jax
import jax.numpy as jnp
from jax.experimental import pallas as pl
from jax.experimental.pallas import tpu as pltpu


def _round_up(x, m):
    return (x + m - 1) // m * m


def _cdiv(a, b):
    return (a + b - 1) // b


def _make_w2v_sm_kernel(tile_n, tile_v, sub_n, num_kv, v_actual, needs_vmask):
    """Streaming-softmax logsumexp kernel (one N tile vs. streamed vocab tiles)."""
    num_sub = tile_n // sub_n
    # Number of real (unpadded) vocab columns in the LAST vocab tile (static).
    v_last = v_actual - (num_kv - 1) * tile_v

    def kernel(x_ref, w_ref, lse_ref, m_sc, l_sc):
        # x_ref:   (TILE_N, E)      bf16  context-embedding rows (resident over kv)
        # w_ref:   (E, TILE_V)      bf16  lane-dense output-projection slab
        # lse_ref: (TILE_N, 128)    f32   per-row logsumexp (written at last kv)
        # m_sc / l_sc: (TILE_N, 1)  f32   running max / running sum-exp
        kv = pl.program_id(1)
        last_kv = pl.num_programs(1) - 1

        @pl.when(kv == 0)
        def _():
            m_sc[...] = jnp.full(m_sc.shape, -jnp.inf, dtype=jnp.float32)
            l_sc[...] = jnp.zeros(l_sc.shape, dtype=jnp.float32)

        w = w_ref[...]                               # (E, TILE_V) bf16

        def chunk(r0, masked):
            rows = pl.ds(r0, sub_n)
            x = x_ref[rows, :]                       # (SUB_N, E) bf16
            # MXU: (SUB_N, E) x (E, TILE_V) -> f32, native orientation.
            logits = jnp.dot(x, w, preferred_element_type=jnp.float32)
            if masked:
                # Only the last vocab tile has zero-padded columns; they must
                # not contribute to the softmax denominator.
                col = jax.lax.broadcasted_iota(jnp.int32, logits.shape, 1)
                logits = jnp.where(col < v_last, logits, -jnp.inf)
            m_prev = m_sc[rows, :]
            m_new = jnp.maximum(m_prev, jnp.max(logits, axis=-1, keepdims=True))
            p = jnp.exp(logits - m_new)
            l_sc[rows, :] = (jnp.exp(m_prev - m_new) * l_sc[rows, :]
                             + jnp.sum(p, axis=-1, keepdims=True))
            m_sc[rows, :] = m_new

        def sweep(masked):
            if num_sub == 1:
                chunk(0, masked)
            else:
                def body(s, carry):
                    chunk(pl.multiple_of(s * sub_n, sub_n), masked)
                    return carry
                jax.lax.fori_loop(0, num_sub, body, 0, unroll=num_sub <= 4)

        if needs_vmask:
            # Gate the padding-mask passes so they cost nothing on all kv steps
            # except the single one that contains padded columns.
            @pl.when(kv == last_kv)
            def _():
                sweep(True)

            @pl.when(kv != last_kv)
            def _():
                sweep(False)
        else:
            sweep(False)

        @pl.when(kv == last_kv)
        def _():
            lse = m_sc[...] + jnp.log(l_sc[...])     # (TILE_N, 1)
            lse_ref[...] = jnp.broadcast_to(lse, lse_ref.shape)

    return kernel


def w2v_sm_forward(center, context, emb_in_weight, emb_out_weight,
                   tile_v=4096, max_tile_n=4096, sub_n=256):
    """JAX wrapper mirroring W2V_SM.forward.

    center:  (B,)   int   target word ids
    context: (B, W) int   context word ids
    emb_in_weight:  (V, E) input embedding table
    emb_out_weight: (V, E) nn.Linear(E, V, bias=False).weight (out_features first)
    """
    B, W = context.shape
    V, E = emb_in_weight.shape
    N = B * W

    # --- plain-JAX glue: embedding gather, center expand, target logit -------
    # TODO(synk): fuse the embedding gather into the kernel via scalar-prefetched
    # context ids (PrefetchScalarGridSpec + row DMA gather).
    ctx_flat = context.reshape(-1)
    x_f32 = jnp.take(emb_in_weight, ctx_flat, axis=0)                 # (N, E)
    c_flat = jnp.broadcast_to(center[:, None], (B, W)).reshape(-1)    # (N,)
    # Target logit in f32 (N x E gather + rowwise dot); removes the per-tile
    # iota/compare/select/sum from the kernel's hot loop.
    # NB: jnp.take clamps out-of-range target ids; PyTorch cross_entropy raises.
    w_center = jnp.take(emb_out_weight, c_flat, axis=0)               # (N, E)
    tgt_logit = jnp.sum(x_f32 * w_center, axis=-1)                    # (N,)

    x = x_f32.astype(jnp.bfloat16)                                    # (N, E)

    # Output projection as a lane-dense (E, V) bf16 slab.  In real training,
    # store the parameter in this layout (bf16, pre-padded) so the transpose,
    # cast and pad below are no-ops at call time.
    w_t = emb_out_weight.T.astype(jnp.bfloat16)                       # (E, V)

    TILE_V = min(tile_v, _round_up(V, 128))
    V_pad = _round_up(V, TILE_V)
    num_kv = V_pad // TILE_V
    if V_pad != V:
        w_t = jnp.pad(w_t, ((0, 0), (0, V_pad - V)))

    # N tiling: keep the whole N tile VMEM-resident so the weight is streamed
    # once per N tile (exactly once when N <= TILE_N).  Use 2 N tiles once N is
    # large enough so the parallel axis shards across v7x's two TensorCores.
    SUB_N = min(sub_n, _round_up(N, 16))          # bf16 sublane packing
    n_tiles_wanted = 2 if N >= 1024 else 1
    TILE_N = min(max_tile_n, _round_up(_cdiv(N, n_tiles_wanted), SUB_N))
    N_pad = _round_up(N, TILE_N)
    if N_pad != N:
        x = jnp.pad(x, ((0, N_pad - N), (0, 0)))

    grid = (N_pad // TILE_N, V_pad // TILE_V)     # rows parallel, vocab reduction last
    kernel = _make_w2v_sm_kernel(TILE_N, TILE_V, SUB_N, num_kv, V, V_pad != V)

    lse = pl.pallas_call(
        kernel,
        out_shape=jax.ShapeDtypeStruct((N_pad, 128), jnp.float32),
        grid=grid,
        in_specs=[
            pl.BlockSpec((TILE_N, E), lambda i, kv: (i, 0)),   # x: resident across kv
            pl.BlockSpec((E, TILE_V), lambda i, kv: (0, kv)),  # w: streamed over vocab
        ],
        out_specs=pl.BlockSpec((TILE_N, 128), lambda i, kv: (i, 0)),
        scratch_shapes=[
            pltpu.VMEM((TILE_N, 1), jnp.float32),   # running max
            pltpu.VMEM((TILE_N, 1), jnp.float32),   # running sum-exp
        ],
        compiler_params=pltpu.CompilerParams(
            dimension_semantics=("parallel", "arbitrary"),
            vmem_limit_bytes=32 * 1024 * 1024,
        ),
        cost_estimate=pl.CostEstimate(
            flops=2 * N_pad * E * V_pad,
            transcendentals=N_pad * V_pad,
            bytes_accessed=(N_pad * E * 2                        # x (bf16), once
                            + (N_pad // TILE_N) * V_pad * E * 2  # weight stream
                            + N_pad * 128 * 4),                  # lse out
        ),
    )(x, w_t)

    # cross_entropy ('mean'): loss_row = logsumexp(logits_row) - logit[target].
    return jnp.mean(lse[:N, 0] - tgt_logit)


def _reference_loss(center, context, emb_in_weight, emb_out_weight):
    """Pure-JAX f32 reference of the PyTorch forward (for correctness check)."""
    B, W = context.shape
    emb_context = jnp.take(emb_in_weight, context, axis=0).reshape(B * W, -1)
    c = jnp.broadcast_to(center[:, None], (B, W)).reshape(B * W)
    pred = emb_context @ emb_out_weight.T
    logp = jax.nn.log_softmax(pred, axis=-1)
    return -jnp.mean(logp[jnp.arange(B * W), c])


if __name__ == "__main__":
    # Small, deterministic synthetic setup (module init: uniform(-0.01, 0.01)).
    initrange = 0.01
    size_vocab, size_embedding = 256, 32
    batch, window = 4, 8

    key = jax.random.PRNGKey(0)
    k_in, k_out, k_center, k_context = jax.random.split(key, 4)

    emb_in_weight = jax.random.uniform(
        k_in, (size_vocab, size_embedding), jnp.float32, -initrange, initrange)
    emb_out_weight = jax.random.uniform(
        k_out, (size_vocab, size_embedding), jnp.float32, -initrange, initrange)

    center = jax.random.randint(k_center, (batch,), 0, size_vocab, dtype=jnp.int32)
    context = jax.random.randint(k_context, (batch, window), 0, size_vocab,
                                 dtype=jnp.int32)

    loss = w2v_sm_forward(center, context, emb_in_weight, emb_out_weight)
    jax.block_until_ready(loss)

    ref = _reference_loss(center, context, emb_in_weight, emb_out_weight)
    # bf16 matmul operands in the kernel => loosen tolerance vs the f32 reference.
    assert jnp.allclose(loss, ref, rtol=2e-3, atol=2e-3), (loss, ref)

    print("KERNEL_OK")
</pallas_src>

<mosaic_0001>
module attributes {stable_mosaic.version = 11 : i64} {
  func.func @kernel(%arg0: i32, %arg1: i32, %arg2: memref<32x32xbf16, #tpu.memory_space<vmem>>, %arg3: memref<32x256xbf16, #tpu.memory_space<vmem>>, %arg4: memref<32x128xf32, #tpu.memory_space<vmem>>, %arg5: memref<32x1xf32, #tpu.memory_space<vmem>>, %arg6: memref<32x1xf32, #tpu.memory_space<vmem>>) attributes {dimension_semantics = [#tpu.dimension_semantics<parallel>, #tpu.dimension_semantics<arbitrary>], iteration_bounds = array<i64: 1, 1>, scalar_prefetch = 0 : i64, scratch_operands = 2 : i64, tpu.core_type = #tpu.core_type<tc>, window_params = [{transform_indices = @transform_0, window_bounds = array<i64: 32, 32>}, {transform_indices = @transform_1, window_bounds = array<i64: 32, 256>}, {transform_indices = @transform_2, window_bounds = array<i64: 32, 128>}]} {
    %c0_i32 = arith.constant 0 : i32
    %0 = arith.cmpi eq, %arg1, %c0_i32 : i32
    %1 = arith.extui %0 : i1 to i32
    %c0_i32_0 = arith.constant 0 : i32
    %2 = arith.cmpi ne, %1, %c0_i32_0 : i32
    scf.if %2 {
      %cst_16 = arith.constant 0xFF800000 : f32
      %25 = vector.broadcast %cst_16 : f32 to vector<32x1xf32>
      %c0_17 = arith.constant 0 : index
      %c0_18 = arith.constant 0 : index
      %26 = vector.load %arg5[%c0_17, %c0_18] : memref<32x1xf32, #tpu.memory_space<vmem>>, vector<32x1xf32>
      tpu.vector_store %arg5[%c0_17, %c0_18], %25 {strides = array<i32>} : memref<32x1xf32, #tpu.memory_space<vmem>>, vector<32x1xf32>,
      %cst_19 = arith.constant 0.000000e+00 : f32
      %27 = vector.broadcast %cst_19 : f32 to vector<32x1xf32>
      %c0_20 = arith.constant 0 : index
      %c0_21 = arith.constant 0 : index
      %28 = vector.load %arg6[%c0_20, %c0_21] : memref<32x1xf32, #tpu.memory_space<vmem>>, vector<32x1xf32>
      tpu.vector_store %arg6[%c0_20, %c0_21], %27 {strides = array<i32>} : memref<32x1xf32, #tpu.memory_space<vmem>>, vector<32x1xf32>,
    } else {
    }
    %c0 = arith.constant 0 : index
    %c0_1 = arith.constant 0 : index
    %3 = vector.load %arg3[%c0, %c0_1] : memref<32x256xbf16, #tpu.memory_space<vmem>>, vector<32x256xbf16>
    %c0_2 = arith.constant 0 : index
    %c0_3 = arith.constant 0 : index
    %4 = vector.load %arg2[%c0_2, %c0_3] : memref<32x32xbf16, #tpu.memory_space<vmem>>, vector<32x32xbf16>
    %cst = arith.constant dense<0.000000e+00> : vector<32x256xf32>
    %5 = tpu.matmul %4, %3, %cst {dimension_numbers = #tpu.dot_dimension_numbers<[1], [0], [0], [1], [0, 0, 1, 1], [], []>} : vector<32x32xbf16>, vector<32x256xbf16>, vector<32x256xf32> -> vector<32x256xf32>
    %c0_4 = arith.constant 0 : index
    %c0_5 = arith.constant 0 : index
    %6 = vector.load %arg5[%c0_4, %c0_5] : memref<32x1xf32, #tpu.memory_space<vmem>>, vector<32x1xf32>
    %cst_6 = arith.constant dense<0xFF800000> : vector<32xf32>
    %7 = vector.multi_reduction <maximumf>, %5, %cst_6 [1] : vector<32x256xf32> to vector<32xf32>
    %8 = vector.shape_cast %7 : vector<32xf32> to vector<32x1xf32>
    %9 = arith.maximumf %6, %8 : vector<32x1xf32>
    %10 = vector.broadcast %9 : vector<32x1xf32> to vector<32x256xf32>
    %11 = arith.subf %5, %10 : vector<32x256xf32>
    %12 = math.exp %11 : vector<32x256xf32>
    %13 = arith.subf %6, %9 : vector<32x1xf32>
    %14 = math.exp %13 : vector<32x1xf32>
    %c0_7 = arith.constant 0 : index
    %c0_8 = arith.constant 0 : index
    %15 = vector.load %arg6[%c0_7, %c0_8] : memref<32x1xf32, #tpu.memory_space<vmem>>, vector<32x1xf32>
    %16 = arith.mulf %14, %15 : vector<32x1xf32>
    %cst_9 = arith.constant dense<0.000000e+00> : vector<32xf32>
    %17 = vector.multi_reduction <add>, %12, %cst_9 [1] : vector<32x256xf32> to vector<32xf32>
    %18 = vector.shape_cast %17 : vector<32xf32> to vector<32x1xf32>
    %19 = arith.addf %16, %18 : vector<32x1xf32>
    %c0_10 = arith.constant 0 : index
    %c0_11 = arith.constant 0 : index
    %20 = vector.load %arg6[%c0_10, %c0_11] : memref<32x1xf32, #tpu.memory_space<vmem>>, vector<32x1xf32>
    tpu.vector_store %arg6[%c0_10, %c0_11], %19 {strides = array<i32>} : memref<32x1xf32, #tpu.memory_space<vmem>>, vector<32x1xf32>,
    %c0_12 = arith.constant 0 : index
    %c0_13 = arith.constant 0 : index
    %21 = vector.load %arg5[%c0_12, %c0_13] : memref<32x1xf32, #tpu.memory_space<vmem>>, vector<32x1xf32>
    tpu.vector_store %arg5[%c0_12, %c0_13], %9 {strides = array<i32>} : memref<32x1xf32, #tpu.memory_space<vmem>>, vector<32x1xf32>,
    %c0_i32_14 = arith.constant 0 : i32
    %22 = arith.cmpi eq, %arg1, %c0_i32_14 : i32
    %23 = arith.extui %22 : i1 to i32
    %c0_i32_15 = arith.constant 0 : i32
    %24 = arith.cmpi ne, %23, %c0_i32_15 : i32
    scf.if %24 {
      %c0_16 = arith.constant 0 : index
      %c0_17 = arith.constant 0 : index
      %25 = vector.load %arg5[%c0_16, %c0_17] : memref<32x1xf32, #tpu.memory_space<vmem>>, vector<32x1xf32>
      %c0_18 = arith.constant 0 : index
      %c0_19 = arith.constant 0 : index
      %26 = vector.load %arg6[%c0_18, %c0_19] : memref<32x1xf32, #tpu.memory_space<vmem>>, vector<32x1xf32>
      %27 = math.log %26 : vector<32x1xf32>
      %28 = arith.addf %25, %27 : vector<32x1xf32>
      %29 = vector.shape_cast %28 : vector<32x1xf32> to vector<32x1xf32>
      %30 = vector.broadcast %29 : vector<32x1xf32> to vector<32x128xf32>
      %c0_20 = arith.constant 0 : index
      %c0_21 = arith.constant 0 : index
      %31 = vector.load %arg4[%c0_20, %c0_21] : memref<32x128xf32, #tpu.memory_space<vmem>>, vector<32x128xf32>
      tpu.vector_store %arg4[%c0_20, %c0_21], %30 {strides = array<i32>} : memref<32x128xf32, #tpu.memory_space<vmem>>, vector<32x128xf32>,
    } else {
    }
    return
  }
  func.func @transform_0(%arg0: i32, %arg1: i32) -> (i32, i32) {
    %c0_i32 = arith.constant 0 : i32
    %c0_i32_0 = arith.constant 0 : i32
    return %arg0, %c0_i32 : i32, i32
  }
  func.func @transform_1(%arg0: i32, %arg1: i32) -> (i32, i32) {
    %c0_i32 = arith.constant 0 : i32
    %c0_i32_0 = arith.constant 0 : i32
    return %c0_i32, %arg1 : i32, i32
  }
  func.func @transform_2(%arg0: i32, %arg1: i32) -> (i32, i32) {
    %c0_i32 = arith.constant 0 : i32
    %c0_i32_0 = arith.constant 0 : i32
    return %arg0, %c0_i32 : i32, i32
  }
}

</mosaic_0001>

<bundles_post_ra>
// kernel: tpu_custom_call.1
= control target key start
LH: loop header
LB: loop body
LE: loop exit
PB: predicated region body
PF: predicated region fallthrough
CT: control target
= control target key end

     0   :  { %7 = vsyncpa [#allocation5], 0  ;;  %s571_s0 = inlined_call_operand.hbm [shape: bf16[32,32], index: 0, kind: input, shape index: {}]   ;;  %s572_s1 = inlined_call_operand.hbm [shape: bf16[32,256], index: 1, kind: input, shape index: {}]   ;;  %s573_s2 = inlined_call_operand.hbm [shape: f32[32,128], index: 2, kind: output, shape index: {}]  }
   0x1   :  { %8 = vsyncpa [#allocation8], 0 }
   0x2   :  { %9 = vsyncpa [#allocation6], 0  ;;  %s462_s9 = smov [#allocation4]   ;;  %s390_s13 = scalar_lea.hbm %s571_s0, 256 }
   0x3   :  { %s15_s10 = sshll.u32 %s462_s9, 4  ;;  %p391_p0 = scmp.ne.s32.totalorder %s571_s0, %s390_s13  ;;  %s16_s10 = int_to_ptr.vmem [resolvable:$true] %s15_s10 }
   0x4   :  { %p394_p1 = scmp.lt.u32.totalorder %s390_s13, %s571_s0 }
   0x6   :  { %p396_p2 = pnand %p394_p1, %p391_p0 }
   0x8   :  { %399 = shalt.err (!%p396_p2)
}
   0x9   :  { %s400_s18 = scalar_lea.vmem %s16_s10, 256  ;;  %p405_p4 = scmp.lt.s32.totalorder %s16_s10, %s16_s10 }
   0xa   :  { %p401_p3 = scmp.ne.s32.totalorder %s16_s10, %s400_s18  ;;  %p406_p5 = scmp.lt.s32.totalorder %s400_s18, %s400_s18 }
   0xc   :  { %p407_p6 = por %p406_p5, %p405_p4 }
   0xe   :  { %p408_p7 = pnand %p407_p6, %p401_p3 }
  0x10   :  { %411 = shalt.err (!%p408_p7)
}
  0x11   :  { %s463_s19 = smov 64   ;;  %s464_s20 = smov 4  }
  0x12   :  { %21 = dma.hbm_to_vmem [thread:$0]  %s571_s0, 256, %s16_s10, [#allocation5], %s463_s19, %s463_s19, %s464_s20  }
  0x13   :  { %s465_s23 = smov [#allocation7]   ;;  %s412_s27 = scalar_lea.hbm %s572_s1, 512 }
  0x14   :  { %s27_s24 = sshll.u32 %s465_s23, 4  ;;  %p413_p8 = scmp.ne.s32.totalorder %s572_s1, %s412_s27  ;;  %s28_s24 = int_to_ptr.vmem [resolvable:$true] %s27_s24 }
  0x15   :  { %p416_p9 = scmp.lt.u32.totalorder %s412_s27, %s572_s1 }
  0x17   :  { %p418_p10 = pnand %p416_p9, %p413_p8 }
  0x19   :  { %421 = shalt.err (!%p418_p10)
}
  0x1a   :  { %s422_s4 = scalar_lea.vmem %s28_s24, 512  ;;  %p427_p12 = scmp.lt.s32.totalorder %s28_s24, %s28_s24 }
  0x1b   :  { %p423_p11 = scmp.ne.s32.totalorder %s28_s24, %s422_s4  ;;  %p428_p13 = scmp.lt.s32.totalorder %s422_s4, %s422_s4 }
  0x1d   :  { %p429_p0 = por %p428_p13, %p427_p12 }
  0x1f   :  { %p430_p1 = pnand %p429_p0, %p423_p11 }
  0x21   :  { %433 = shalt.err (!%p430_p1)
}
  0x22   :  { %s466_s0 = smov 128   ;;  %s467_s5 = smov 8  }
  0x23   :  { %33 = dma.hbm_to_vmem [thread:$0]  %s572_s1, 512, %s28_s24, [#allocation8], %s466_s0, %s466_s0, %s467_s5  }
  0x24   :  { %456 = dma.done.wait [#allocation5], 256  }
  0x25   :  { %457 = vsyncadd [#allocation5], 4294967040 }
  0x26   :  { %458 = dma.done.wait [#allocation8], 512  }
  0x27   :  { %459 = vsyncadd [#allocation8], 4294966784  ;;  %v468_v0 = vmov 0   ;;  %v350_v1 = vld [vmem:[#allocation7 + $0x4] ss:$8 sps:$4 sm:$0xff]   ;;  %v356_v5 = vld [vmem:[#allocation4] sm:$0xff]  }
  0x28   :  { %131 = vmatprep.mubr.bf16.mxu0 %v468_v0  ;;  %141 = vmatprep.mubr.bf16.mxu1 %v468_v0  ;;  %v352_v2 = vld [vmem:[#allocation7] ss:$8 sps:$4 sm:$0xff]   ;;  %v353_v3 = vld [vmem:[#allocation7 + $0x14] ss:$8 sps:$4 sm:$0xff]   ;;  %v355_v4 = vld [vmem:[#allocation7 + $0x10] ss:$8 sps:$4 sm:$0xff]  }
  0x29   :  { %349 = vset.pattern.permute.xlu1 %v468_v0  ;;  %348 = vset.pattern.permute.xlu0 %v468_v0  ;;  %v357_v6 = vld [vmem:[#allocation4 + $0x8] sm:$0xff]   ;;  %vm92_vm0 = vcmask 261120   ;;  %vm45_vm1 = vcmask 7168   ;;  %v469_v7 = vmov -inf   ;;  %v470_v20 = vmov 0.0   ;;  %s471_s1 = smov [#allocation9]  }
  0x2a   :  { %99 = vmatprep.subr.bf16.mxu0 %v350_v1  ;;  %334 = vmatprep.subr.bf16.mxu1 %v350_v1  ;;  %48 = vst.msk [vmem:[#allocation2 + $0x10] sm:$0xff] %vm45_vm1, %v469_v7  ;;  %46 = vst.msk [vmem:[#allocation2] sm:$0xff] %vm45_vm1, %v469_v7  ;;  %s313_s8 = sshll.u32 %s471_s1, 4  ;;  %s314_s8 = int_to_ptr.vmem [resolvable:$true] %s313_s8 }
  0x2b   :  { %100 = vmatpush1.bf16.msra.mxu0 %v352_v2  ;;  %336 = vmatpush1.bf16.msra.mxu1 %v352_v2  ;;  %47 = vst.msk [vmem:[#allocation2 + $0x8] sm:$0xff] %vm45_vm1, %v469_v7  ;;  %49 = vst.msk [vmem:[#allocation2 + $0x18] sm:$0xff] %vm45_vm1, %v469_v7  ;;  %s434_s9 = scalar_lea.vmem %s314_s8, 512  ;;  %p439_p3 = scmp.lt.s32.totalorder %s314_s8, %s314_s8 }
  0x2c   :  { %101 = vmatprep.subr.bf16.mxu0 %v353_v3  ;;  %335 = vmatprep.subr.bf16.mxu1 %v353_v3  ;;  %50 = vst.msk [vmem:[#allocation3] sm:$0xff] %vm45_vm1, %v470_v20  ;;  %51 = vst.msk [vmem:[#allocation3 + $0x8] sm:$0xff] %vm45_vm1, %v470_v20  ;;  %p435_p2 = scmp.ne.s32.totalorder %s314_s8, %s434_s9  ;;  %p440_p4 = scmp.lt.s32.totalorder %s434_s9, %s434_s9 }
  0x2d   :  { %52 = vst.msk [vmem:[#allocation3 + $0x10] sm:$0xff] %vm45_vm1, %v470_v20  ;;  %53 = vst.msk [vmem:[#allocation3 + $0x18] sm:$0xff] %vm45_vm1, %v470_v20 }
  0x2e   :  { %p441_p5 = por %p440_p4, %p439_p3 }
  0x2f   :  { %102 = vmatpush1.bf16.msra.mxu0 %v355_v4  ;;  %337 = vmatpush1.bf16.msra.mxu1 %v355_v4 }
  0x30   :  { %p442_p6 = pnand %p441_p5, %p435_p2 }
  0x31   :  { %v525_v21 = vld [vmem:[#allocation2 + $0x10] sm:$0xff]  ;;  %v527_v22 = vld [vmem:[#allocation2] sm:$0xff] }
  0x32   :  { %332 = vmatmul.mubr.msk.bf16.vlgmr.msra.gmra.mrb[0].mxu0 %vm92_vm0, %v356_v5  ;;  %333 = vmatmul.mubr.msk.bf16.vlgmr.msra.gmra.mrb[0].mxu1 %vm92_vm0, %v357_v6  ;;  %v535_v27 = vld [vmem:[#allocation2 + $0x18] sm:$0xff]  ;;  %v153_v28 = vld [vmem:[#allocation2 + $0x8] sm:$0xff] }
 0x105   :  { %v133_v8 = vpop.f32.mrb[0].mxu0  ;;  %v143_v9 = vpop.f32.mrb[0].mxu1 }
 0x106   :  { %v135_v10 = vpop.f32.mrb[1].mxu0  ;;  %v145_v11 = vpop.f32.mrb[1].mxu1 }
 0x107   :  { %v137_v12 = vpop.f32.mrb[2].mxu0  ;;  %v518_v13 = vpop.f32.mrb[2].mxu1  ;;  %v162_v14 = vmax.f32 %v143_v9, %v145_v11  ;;  %v156_v15 = vmax.f32 %v133_v8, %v135_v10 }
 0x108   :  { %v139_v16 = vpop.f32.mrb[3].mxu0  ;;  %v149_v17 = vpop.f32.mrb[3].mxu1 }
 0x109   :  { %v159_v18 = vmax.f32 %v137_v12, %v139_v16  ;;  %v165_v19 = vmax.f32 %v518_v13, %v149_v17  ;;  %163 = vmax.xlane.f32.xlu1 %v162_v14  ;;  %157 = vmax.xlane.f32.xlu0 %v156_v15 }
 0x10d   :  { %166 = vmax.xlane.f32.xlu1 %v165_v19  ;;  %160 = vmax.xlane.f32.xlu0 %v159_v18 }
 0x196   :  { %v164_v23 = vpop.xlane.xlu1 %163  ;;  %v158_v24 = vpop.xlane.xlu0 %157 }
 0x197   :  { %v530_v25 = vmax.f32 %v525_v21, %v164_v23  ;;  %v533_v26 = vmax.f32 %v527_v22, %v158_v24  ;;  %v231_v24 = vld [vmem:[#allocation3 + $0x18] sm:$0xff] }
 0x199   :  { %v218_v29 = vsub.f32 %v525_v21, %v530_v25  ;;  %259 = vst.msk [vmem:[#allocation2 + $0x10] sm:$0xff] %vm45_vm1, %v530_v25  ;;  %v216_v30 = vsub.f32 %v527_v22, %v533_v26  ;;  %257 = vst.msk [vmem:[#allocation2] sm:$0xff] %vm45_vm1, %v533_v26  ;;  %184 = vperm.xlu1 %349, %v530_v25   ;;  %174 = vperm.xlu0 %348, %v533_v26  }
 0x19a   :  { %v167_v31 = vpop.xlane.xlu1 %166  ;;  %v161_v32 = vpop.xlane.xlu0 %160 }
 0x19b   :  { %v171_v33 = vmax.f32 %v535_v27, %v167_v31  ;;  %v169_v34 = vmax.f32 %v153_v28, %v161_v32  ;;  %v220_v5 = vmul.f32 1.442695, %v216_v30  ;;  %v224_v7 = vmul.f32 1.442695, %v218_v29 }
 0x19d   :  { %v219_v35 = vsub.f32 %v535_v27, %v171_v33  ;;  %260 = vst.msk [vmem:[#allocation2 + $0x18] sm:$0xff] %vm45_vm1, %v171_v33  ;;  %v217_v36 = vsub.f32 %v153_v28, %v169_v34  ;;  %258 = vst.msk [vmem:[#allocation2 + $0x8] sm:$0xff] %vm45_vm1, %v169_v34  ;;  %179 = vperm.xlu1 %349, %v169_v34  }
 0x19f   :  { %v222_v6 = vmul.f32 1.442695, %v217_v36 }
 0x1a0   :  { %v264_v36 = vld [vmem:[#allocation2] sm:$0xff] }
 0x1a1   :  { %189 = vperm.xlu1 %349, %v171_v33  }
 0x218   :  { %v185_v37 = vpop.permute.xlu1 %184  ;;  %v175_v38 = vpop.permute.xlu0 %174 }
 0x219   :  { %v196_v39 = vsub.f32 %v143_v9, %v185_v37  ;;  %v197_v40 = vsub.f32 %v145_v11, %v185_v37  ;;  %v192_v41 = vsub.f32 %v133_v8, %v175_v38  ;;  %v193_v42 = vsub.f32 %v135_v10, %v175_v38  ;;  %v228_v10 = vld [vmem:[#allocation3] sm:$0xff] }
 0x21a   :  { %v226_v8 = vmul.f32 1.442695, %v219_v35 }
 0x21b   :  { %v208_v43 = vmul.f32 1.442695, %v196_v39  ;;  %v210_v44 = vmul.f32 1.442695, %v197_v40  ;;  %v200_v45 = vmul.f32 1.442695, %v192_v41 }
 0x21c   :  { %v202_v46 = vmul.f32 1.442695, %v193_v42  ;;  %v180_v47 = vpop.permute.xlu1 %179  ;;  %v265_v40 = vld [vmem:[#allocation2 + $0x8] sm:$0xff] }
 0x21d   :  { %358 = vpow2.f32 %v208_v43  ;;  %v194_v48 = vsub.f32 %v137_v12, %v180_v47  ;;  %v195_v49 = vsub.f32 %v139_v16, %v180_v47  ;;  %v229_v12 = vld [vmem:[#allocation3 + $0x8] sm:$0xff]  ;;  %v230_v16 = vld [vmem:[#allocation3 + $0x10] sm:$0xff]  ;;  %v267_v47 = vld [vmem:[#allocation2 + $0x18] sm:$0xff] }
 0x21e   :  { %360 = vpow2.f32 %v210_v44  ;;  %v266_v43 = vld [vmem:[#allocation2 + $0x10] sm:$0xff] }
 0x21f   :  { %362 = vpow2.f32 %v200_v45  ;;  %v204_v50 = vmul.f32 1.442695, %v194_v48  ;;  %v206_v51 = vmul.f32 1.442695, %v195_v49 }
 0x220   :  { %364 = vpow2.f32 %v202_v46  ;;  %v190_v52 = vpop.permute.xlu1 %189 }
 0x221   :  { %366 = vpow2.f32 %v204_v50  ;;  %v198_v53 = vsub.f32 %v518_v13, %v190_v52  ;;  %v199_v54 = vsub.f32 %v149_v17, %v190_v52 }
 0x222   :  { %368 = vpow2.f32 %v206_v51 }
 0x223   :  { %v212_v55 = vmul.f32 1.442695, %v198_v53  ;;  %v214_v56 = vmul.f32 1.442695, %v199_v54 }
 0x225   :  { %370 = vpow2.f32 %v212_v55 }
 0x226   :  { %372 = vpow2.f32 %v214_v56 }
 0x227   :  { %v359_v57 = vpop.eup %358  ;;  %374 = vpow2.f32 %v220_v5 }
 0x228   :  { %v361_v58 = vpop.eup %360  ;;  %376 = vpow2.f32 %v222_v6 }
 0x229   :  { %v363_v59 = vpop.eup %362  ;;  %v242_v60 = vadd.f32 %v361_v58, %v359_v57  ;;  %378 = vpow2.f32 %v224_v7 }
 0x22a   :  { %v365_v61 = vpop.eup %364  ;;  %380 = vpow2.f32 %v226_v8 }
 0x22b   :  { %v367_v62 = vpop.eup %366  ;;  %v236_v63 = vadd.f32 %v365_v61, %v363_v59 }
 0x22c   :  { %v369_v0 = vpop.eup %368 }
 0x22d   :  { %237 = vadd.xlane.f32.xlu1 %v236_v63  ;;  %v239_v1 = vadd.f32 %v369_v0, %v367_v62 }
 0x22f   :  { %v371_v2 = vpop.eup %370  ;;  %240 = vadd.xlane.f32.xlu0 %v239_v1 }
 0x230   :  { %v373_v3 = vpop.eup %372 }
 0x231   :  { %243 = vadd.xlane.f32.xlu1 %v242_v60  ;;  %v245_v4 = vadd.f32 %v373_v3, %v371_v2  ;;  %v375_v9 = vpop.eup %374 }
 0x232   :  { %v377_v11 = vpop.eup %376  ;;  %v232_v13 = vmul.f32 %v375_v9, %v228_v10 }
 0x233   :  { %v379_v14 = vpop.eup %378  ;;  %v233_v18 = vmul.f32 %v377_v11, %v229_v12 }
 0x234   :  { %v234_v20 = vmul.f32 %v379_v14, %v230_v16  ;;  %v381_v22 = vpop.eup %380 }
 0x235   :  { %246 = vadd.xlane.f32.xlu1 %v245_v4  ;;  %v235_v26 = vmul.f32 %v381_v22, %v231_v24 }
 0x2ba   :  { %v238_v15 = vpop.xlane.xlu1 %237 }
 0x2bb   :  { %v248_v17 = vadd.f32 %v238_v15, %v232_v13 }
 0x2bc   :  { %v241_v19 = vpop.xlane.xlu0 %240 }
 0x2bd   :  { %253 = vst.msk [vmem:[#allocation3] sm:$0xff] %vm45_vm1, %v248_v17  ;;  %v249_v21 = vadd.f32 %v241_v19, %v233_v18 }
 0x2be   :  { %v244_v23 = vpop.xlane.xlu1 %243 }
 0x2bf   :  { %v250_v25 = vadd.f32 %v244_v23, %v234_v20  ;;  %254 = vst.msk [vmem:[#allocation3 + $0x8] sm:$0xff] %vm45_vm1, %v249_v21 }
 0x2c1   :  { %255 = vst.msk [vmem:[#allocation3 + $0x10] sm:$0xff] %vm45_vm1, %v250_v25 }
 0x2c2   :  { %v247_v27 = vpop.xlane.xlu1 %246 }
 0x2c3   :  { %v251_v28 = vadd.f32 %v247_v27, %v235_v26 }
 0x2c4   :  { %v268_v29 = vld [vmem:[#allocation3] sm:$0xff] }
 0x2c5   :  { %256 = vst.msk [vmem:[#allocation3 + $0x18] sm:$0xff] %vm45_vm1, %v251_v28  ;;  %382 = vlog2.f32 %v268_v29 }
 0x2c6   :  { %v269_v30 = vld [vmem:[#allocation3 + $0x8] sm:$0xff] }
 0x2c7   :  { %384 = vlog2.f32 %v269_v30 }
 0x2c8   :  { %v270_v31 = vld [vmem:[#allocation3 + $0x10] sm:$0xff] }
 0x2c9   :  { %386 = vlog2.f32 %v270_v31 }
 0x2cc   :  { %v271_v32 = vld [vmem:[#allocation3 + $0x18] sm:$0xff] }
 0x2cd   :  { %388 = vlog2.f32 %v271_v32 }
 0x2cf   :  { %v383_v33 = vpop.eup %382 }
 0x2d0   :  { %v273_v34 = vmul.f32 0.6931472, %v383_v33 }
 0x2d1   :  { %v385_v35 = vpop.eup %384 }
 0x2d2   :  { %v280_v37 = vadd.f32 %v273_v34, %v264_v36  ;;  %v275_v38 = vmul.f32 0.6931472, %v385_v35 }
 0x2d3   :  { %v387_v39 = vpop.eup %386 }
 0x2d4   :  { %286 = vperm.xlu1 %349, %v280_v37   ;;  %v281_v41 = vadd.f32 %v275_v38, %v265_v40  ;;  %v277_v42 = vmul.f32 0.6931472, %v387_v39 }
 0x2d6   :  { %291 = vperm.xlu0 %348, %v281_v41   ;;  %v282_v44 = vadd.f32 %v277_v42, %v266_v43 }
 0x2d7   :  { %v389_v45 = vpop.eup %388 }
 0x2d8   :  { %296 = vperm.xlu1 %349, %v282_v44   ;;  %v279_v46 = vmul.f32 0.6931472, %v389_v45 }
 0x2da   :  { %v283_v48 = vadd.f32 %v279_v46, %v267_v47 }
 0x2dc   :  { %301 = vperm.xlu1 %349, %v283_v48  }
 0x353   :  { %v287_v49 = vpop.permute.xlu1 %286 }
 0x354   :  { %304 = vst [vmem:[#allocation9] sm:$0xff] %v287_v49 }
 0x355   :  { %v292_v50 = vpop.permute.xlu0 %291 }
 0x356   :  { %305 = vst [vmem:[#allocation9 + $0x8] sm:$0xff] %v292_v50 }
 0x357   :  { %v297_v51 = vpop.permute.xlu1 %296 }
 0x358   :  { %306 = vst [vmem:[#allocation9 + $0x10] sm:$0xff] %v297_v51 }
 0x35b   :  { %v302_v52 = vpop.permute.xlu1 %301 }
 0x35c   :  { %307 = vst [vmem:[#allocation9 + $0x18] sm:$0xff] %v302_v52 }
 0x35d   :  { %445 = shalt.err (!%p442_p6)
}
 0x35e   :  { %s446_s12 = scalar_lea.hbm %s573_s2, 512 }
 0x35f   :  { %p447_p7 = scmp.ne.s32.totalorder %s573_s2, %s446_s12  ;;  %p450_p8 = scmp.lt.u32.totalorder %s446_s12, %s573_s2 }
 0x361   :  { %p452_p9 = pnand %p450_p8, %p447_p7 }
 0x363   :  { %455 = shalt.err (!%p452_p9)
}
 0x364   :  { %319 = dma.vmem_to_hbm [thread:$0]  %s314_s8, 512, %s573_s2, [#allocation6], %s466_s0, %s466_s0, %s467_s5  }
 0x365   :  { %460 = dma.done.wait [#allocation6], 512  }
 0x366   :  { %461 = vsyncadd [#allocation6], 4294966784 }
 0x367   :  { %323 = vsyncpa [#allocation5], 1 }
 0x368   :  { %324 = vsyncpa [#allocation8], 1 }
 0x369   :  { %325 = vsyncpa [#allocation6], 1 }

</bundles_post_ra>
